<compile_context>
chip_gen: v7x
topology: tpu7x:2x2x1
jax: 0.10.0
libtpu: 0.0.40
codegen_flags: <defaults>
</compile_context>

<pallas_src>
import functools

import jax
import jax.numpy as jnp
from jax.experimental import pallas as pl
from jax.experimental.pallas import tpu as pltpu

_D_CHUNK = 512                 # lane chunk for the D reduction (multiple of 128)
_VMEM_TILE_BUDGET = 36 << 20   # live-set budget used when auto-picking batch_tile
_VMEM_LIMIT_CAP = 48 << 20     # scoped-vmem cap; leaves headroom on v7x (64 MiB / TC)
_BLOCK_BYTES_CAP = 12 << 20    # target per-input-block size (DMA granularity)


def _pick_batch_tile(B, D, itemsize, d_chunk):
    """Largest sublane-aligned batch tile whose full live set fits the VMEM budget."""
    eff_chunk = min(D, d_chunk)
    # Resident bytes per batch row:
    #   2 inputs x 2 pipeline buffers (input dtype)
    # + ~6 chunk-sized f32 temporaries (s/t upcasts + three products, accumulators)
    per_row = 2 * 2 * D * itemsize + 6 * eff_chunk * 4
    rows_by_vmem = _VMEM_TILE_BUDGET // max(per_row, 1)
    rows_by_block = _BLOCK_BYTES_CAP // max(D * itemsize, 1)   # byte-based cap, not rows
    tile = max(8, min(rows_by_vmem, rows_by_block))
    tile = max(8, (tile // 8) * 8)                              # sublane-aligned
    if tile >= B:
        # Keep >= 2 grid steps so v7x megacore sharding and pipelining can engage.
        if B > 8:
            tile = max(8, (((B + 1) // 2 + 7) // 8) * 8)
        else:
            tile = B                                            # tiny batch: one block
    return int(min(tile, B))


def _cosine_partial_kernel(s_ref, t_ref, o_ref, *, eps, total_b, batch_tile,
                           d, d_chunk, mask_tail):
    """One batch tile -> one lane-dense (1, 8, 128) slab holding its sum of (1 - cos)."""
    i = pl.program_id(0)

    def chunk_sums(start, size):
        s = s_ref[:, pl.ds(start, size)].astype(jnp.float32)
        t = t_ref[:, pl.ds(start, size)].astype(jnp.float32)
        dot = jnp.sum(s * t, axis=1, keepdims=True)
        ss = jnp.sum(s * s, axis=1, keepdims=True)
        tt = jnp.sum(t * t, axis=1, keepdims=True)
        return dot, ss, tt

    if d <= d_chunk:
        dot, ss, tt = chunk_sums(0, d)
    else:
        n_full = d // d_chunk
        rem = d - n_full * d_chunk

        def body(c, carry):
            acc_dot, acc_ss, acc_tt = carry
            start = pl.multiple_of(c * d_chunk, d_chunk)
            pdot, pss, ptt = chunk_sums(start, d_chunk)
            return acc_dot + pdot, acc_ss + pss, acc_tt + ptt

        zeros = jnp.zeros((batch_tile, 1), jnp.float32)
        dot, ss, tt = jax.lax.fori_loop(
            0, n_full, body, (zeros, zeros, zeros), unroll=(n_full <= 8))
        if rem > 0:
            pdot, pss, ptt = chunk_sums(n_full * d_chunk, rem)
            dot, ss, tt = dot + pdot, ss + pss, tt + ptt

    # cos = dot / max(||s|| * ||t||, eps); sqrt runs on the EUP (free slot) and
    # clamping the product of norms (not its square) matches the reference range.
    norm = jnp.sqrt(ss) * jnp.sqrt(tt)
    one_minus = 1.0 - dot / jnp.maximum(norm, eps)            # (TB, 1) f32

    def write(vals):
        o_ref[...] = jnp.broadcast_to(jnp.sum(vals), (1, 8, 128)).astype(jnp.float32)

    if mask_tail:
        is_last = i == pl.num_programs(0) - 1

        @pl.when(is_last)
        def _():
            row = i * batch_tile + jax.lax.broadcasted_iota(
                jnp.int32, (batch_tile, 1), 0)
            # jnp.where (select semantics) safely discards NaN/Inf from the
            # OOB-padded rows of the last block — do not turn into multiply-by-0.
            write(jnp.where(row < total_b, one_minus, 0.0))

        @pl.when(jnp.logical_not(is_last))
        def _():
            write(one_minus)
    else:
        write(one_minus)


def cosine_distill(student, teacher, *, beta=100.0, eps=1e-8,
                   batch_tile=None, d_chunk=_D_CHUNK):
    assert student.shape == teacher.shape and student.ndim == 2
    B, D = student.shape
    itemsize = jnp.dtype(student.dtype).itemsize
    d_chunk = int(d_chunk)
    if batch_tile is None:
        batch_tile = _pick_batch_tile(B, D, itemsize, d_chunk)
    batch_tile = int(min(int(batch_tile), B))
    num_tiles = int(pl.cdiv(B, batch_tile))
    mask_tail = (B % batch_tile) != 0

    # Scoped-VMEM limit: count pipelined input blocks AND the chunk-bounded f32
    # temporaries, plus headroom; capped so v7x's 64 MiB per-TC VMEM is never blown.
    block_bytes = 2 * 2 * batch_tile * D * itemsize
    temp_bytes = 6 * batch_tile * min(D, d_chunk) * 4
    vmem_limit = int(min(_VMEM_LIMIT_CAP,
                         max(32 << 20, block_bytes + temp_bytes + (4 << 20))))

    kernel = functools.partial(
        _cosine_partial_kernel,
        eps=float(eps),
        total_b=int(B),
        batch_tile=batch_tile,
        d=int(D),
        d_chunk=d_chunk,
        mask_tail=mask_tail,
    )

    # TODO(synk): optional v5e/v6e single-core variant: accumulate in a VMEM scratch
    # with the axis marked "arbitrary" to skip the (num_tiles, 8, 128) HBM writeback.
    partials = pl.pallas_call(
        kernel,
        out_shape=jax.ShapeDtypeStruct((num_tiles, 8, 128), jnp.float32),
        grid_spec=pltpu.PrefetchScalarGridSpec(
            num_scalar_prefetch=0,
            grid=(num_tiles,),
            in_specs=[
                pl.BlockSpec((batch_tile, D), lambda i: (i, 0)),
                pl.BlockSpec((batch_tile, D), lambda i: (i, 0)),
            ],
            out_specs=pl.BlockSpec((1, 8, 128), lambda i: (i, 0, 0)),
        ),
        compiler_params=pltpu.CompilerParams(
            dimension_semantics=("parallel",),   # no carried state -> megacore-shardable
            vmem_limit_bytes=vmem_limit,
        ),
    )(student, teacher)

    # Tiny final reduction / mean / scale in plain JAX.
    return float(beta) * jnp.sum(partials[:, 0, 0]) / B


def _reference(student, teacher, beta=100.0, eps=1e-8):
    student = student.astype(jnp.float32)
    teacher = teacher.astype(jnp.float32)
    dot = jnp.sum(student * teacher, axis=1)
    sn = jnp.linalg.norm(student, axis=1)
    tn = jnp.linalg.norm(teacher, axis=1)
    cos = dot / jnp.maximum(sn * tn, eps)
    return beta * jnp.mean(1.0 - cos)


if __name__ == "__main__":
    key = jax.random.PRNGKey(0)
    keys = jax.random.split(key, 10)

    # Case 1: small even shapes (batch=16, hidden=32), auto tile -> 2 grid steps.
    B, D = 16, 32
    s1 = jax.random.normal(keys[0], (B, D), dtype=jnp.float32)
    t1 = jax.random.normal(keys[1], (B, D), dtype=jnp.float32)
    loss1 = cosine_distill(s1, t1, beta=100.0)
    jax.block_until_ready(loss1)
    assert jnp.allclose(loss1, _reference(s1, t1), rtol=1e-4, atol=1e-4), loss1

    # Case 2: ragged batch (B=20) with a forced small tile -> gated tail masking.
    s2 = jax.random.normal(keys[2], (20, 32), dtype=jnp.float32)
    t2 = jax.random.normal(keys[3], (20, 32), dtype=jnp.float32)
    loss2 = cosine_distill(s2, t2, beta=100.0, batch_tile=8)
    jax.block_until_ready(loss2)
    assert jnp.allclose(loss2, _reference(s2, t2), rtol=1e-4, atol=1e-4), loss2

    # Case 3: bf16 inputs (half the HBM bytes; f32 accumulation inside the kernel).
    s3 = jax.random.normal(keys[4], (16, 32), dtype=jnp.bfloat16)
    t3 = jax.random.normal(keys[5], (16, 32), dtype=jnp.bfloat16)
    loss3 = cosine_distill(s3, t3, beta=100.0)
    jax.block_until_ready(loss3)
    assert jnp.allclose(loss3, _reference(s3, t3), rtol=1e-3, atol=1e-3), loss3

    # Case 4: chunked D reduction, aligned (D=384 with 128-lane chunks -> 3 chunks).
    s4 = jax.random.normal(keys[6], (16, 384), dtype=jnp.float32)
    t4 = jax.random.normal(keys[7], (16, 384), dtype=jnp.float32)
    loss4 = cosine_distill(s4, t4, beta=100.0, d_chunk=128)
    jax.block_until_ready(loss4)
    assert jnp.allclose(loss4, _reference(s4, t4), rtol=1e-4, atol=1e-4), loss4

    # Case 5: chunked D reduction with a remainder chunk (D=448 -> 3 full + 64).
    s5 = jax.random.normal(keys[8], (16, 448), dtype=jnp.float32)
    t5 = jax.random.normal(keys[9], (16, 448), dtype=jnp.float32)
    loss5 = cosine_distill(s5, t5, beta=100.0, d_chunk=128)
    jax.block_until_ready(loss5)
    assert jnp.allclose(loss5, _reference(s5, t5), rtol=1e-4, atol=1e-4), loss5

    print("KERNEL_OK")
</pallas_src>

<mosaic_0001>
module attributes {stable_mosaic.version = 11 : i64} {
  func.func @_cosine_partial_kernel(%arg0: i32, %arg1: memref<8x32xf32, #tpu.memory_space<vmem>>, %arg2: memref<8x32xf32, #tpu.memory_space<vmem>>, %arg3: memref<1x8x128xf32, #tpu.memory_space<vmem>>) attributes {dimension_semantics = [#tpu.dimension_semantics<parallel>], iteration_bounds = array<i64: 2>, scalar_prefetch = 0 : i64, scratch_operands = 0 : i64, tpu.core_type = #tpu.core_type<tc>, window_params = [{transform_indices = @transform_0, window_bounds = array<i64: 8, 32>}, {transform_indices = @transform_1, window_bounds = array<i64: 8, 32>}, {transform_indices = @transform_2, window_bounds = array<i64: 1, 8, 128>}]} {
    %c0 = arith.constant 0 : index
    %c0_0 = arith.constant 0 : index
    %0 = vector.load %arg1[%c0, %c0_0] : memref<8x32xf32, #tpu.memory_space<vmem>>, vector<8x32xf32>
    %c0_1 = arith.constant 0 : index
    %c0_2 = arith.constant 0 : index
    %1 = vector.load %arg2[%c0_1, %c0_2] : memref<8x32xf32, #tpu.memory_space<vmem>>, vector<8x32xf32>
    %2 = arith.mulf %0, %1 : vector<8x32xf32>
    %cst = arith.constant dense<0.000000e+00> : vector<8xf32>
    %3 = vector.multi_reduction <add>, %2, %cst [1] : vector<8x32xf32> to vector<8xf32>
    %4 = vector.shape_cast %3 : vector<8xf32> to vector<8x1xf32>
    %5 = arith.mulf %0, %0 : vector<8x32xf32>
    %cst_3 = arith.constant dense<0.000000e+00> : vector<8xf32>
    %6 = vector.multi_reduction <add>, %5, %cst_3 [1] : vector<8x32xf32> to vector<8xf32>
    %7 = vector.shape_cast %6 : vector<8xf32> to vector<8x1xf32>
    %8 = arith.mulf %1, %1 : vector<8x32xf32>
    %cst_4 = arith.constant dense<0.000000e+00> : vector<8xf32>
    %9 = vector.multi_reduction <add>, %8, %cst_4 [1] : vector<8x32xf32> to vector<8xf32>
    %10 = vector.shape_cast %9 : vector<8xf32> to vector<8x1xf32>
    %11 = math.sqrt %7 : vector<8x1xf32>
    %12 = math.sqrt %10 : vector<8x1xf32>
    %13 = arith.mulf %11, %12 : vector<8x1xf32>
    %cst_5 = arith.constant 9.99999993E-9 : f32
    %14 = vector.broadcast %cst_5 : f32 to vector<8x1xf32>
    %15 = arith.maximumf %13, %14 : vector<8x1xf32>
    %16 = arith.divf %4, %15 : vector<8x1xf32>
    %cst_6 = arith.constant 1.000000e+00 : f32
    %17 = vector.broadcast %cst_6 : f32 to vector<8x1xf32>
    %18 = arith.subf %17, %16 : vector<8x1xf32>
    %19 = vector.shape_cast %18 : vector<8x1xf32> to vector<1x8x1xf32>
    %cst_7 = arith.constant dense<0.000000e+00> : vector<1xf32>
    %20 = vector.multi_reduction <add>, %19, %cst_7 [1, 2] : vector<1x8x1xf32> to vector<1xf32>
    %21 = vector.shape_cast %20 : vector<1xf32> to vector<1x1x1xf32>
    %22 = vector.extract %21[0, 0, 0] : f32 from vector<1x1x1xf32>
    %23 = vector.broadcast %22 : f32 to vector<1x8x128xf32>
    %c0_8 = arith.constant 0 : index
    %c0_9 = arith.constant 0 : index
    %c0_10 = arith.constant 0 : index
    %24 = vector.load %arg3[%c0_8, %c0_9, %c0_10] : memref<1x8x128xf32, #tpu.memory_space<vmem>>, vector<1x8x128xf32>
    tpu.vector_store %arg3[%c0_8, %c0_9, %c0_10], %23 {strides = array<i32>} : memref<1x8x128xf32, #tpu.memory_space<vmem>>, vector<1x8x128xf32>,
    return
  }
  func.func @transform_0(%arg0: i32) -> (i32, i32) {
    %c0_i32 = arith.constant 0 : i32
    %c0_i32_0 = arith.constant 0 : i32
    return %arg0, %c0_i32 : i32, i32
  }
  func.func @transform_1(%arg0: i32) -> (i32, i32) {
    %c0_i32 = arith.constant 0 : i32
    %c0_i32_0 = arith.constant 0 : i32
    return %arg0, %c0_i32 : i32, i32
  }
  func.func @transform_2(%arg0: i32) -> (i32, i32, i32) {
    %c0_i32 = arith.constant 0 : i32
    %c0_i32_0 = arith.constant 0 : i32
    %c0_i32_1 = arith.constant 0 : i32
    return %arg0, %c0_i32, %c0_i32_0 : i32, i32, i32
  }
}

</mosaic_0001>

<bundles_post_ra>
// kernel: tpu_custom_call.1
= control target key start
LH: loop header
LB: loop body
LE: loop exit
PB: predicated region body
PF: predicated region fallthrough
CT: control target
= control target key end

     0   :  { %7 = vsyncpa [#allocation3], 0  ;;  %s788_s0 = inlined_call_operand.hbm [shape: f32[16,32], index: 0, kind: input, shape index: {}]   ;;  %s789_s1 = inlined_call_operand.hbm [shape: f32[16,32], index: 1, kind: input, shape index: {}]   ;;  %s790_s2 = inlined_call_operand.hbm [shape: f32[2,8,128], index: 2, kind: output, shape index: {}]  }
   0x1   :  { %9 = vsyncpa [#allocation3 + $0x1], 0 }
   0x2   :  { %10 = vsyncpa [#allocation6], 0 }
   0x3   :  { %12 = vsyncpa [#allocation6 + $0x1], 0 }
   0x4   :  { %13 = vsyncpa [#allocation4], 0 }
   0x5   :  { %15 = vsyncpa [#allocation4 + $0x1], 0  ;;  %s574_s9 = smov 0   ;;  %s576_s10 = smov 0  }
   0x6   :  { %s578_s11 = smov 0   ;;  %s580_s12 = smov 0  }
   0x7 LB: > { %s595_s13 = sadd.s32 4294967295, %s554_s12   ;;  %s350_s14 = sadd.s32 4294967294, %s554_s12   ;;  %s554_s12 = sphi %s580_s12, %s809_s12   ;;  %s550_s11 = sphi %s578_s11, %s808_s11   ;;  %s546_s10 = sphi %s576_s10, %s807_s10   ;;  %s542_s9 = sphi %s574_s9, %s806_s9  }
   0x8   : > { %s599_s15 = sadd.s32 1, %s554_s12   ;;  %s28_s16 = sadd.s32 1, %s550_s11 }
   0x9   : > { %s25_s17 = ssub.s32 %s554_s12, %s599_s15  ;;  %p35_p0 = scmp.ne.s32.totalorder %s550_s11, %s546_s10 }
   0xa   : > { %p26_p1 = scmp.eq.s32.totalorder %s25_s17, 0  ;;  %p36_p2 = scmp.eq.s32.totalorder %s554_s12, 0 }
   0xb   : > { %p41_p3 = scmp.ne.s32.totalorder %s546_s10, %s542_s9  ;;  %p42_p4 = scmp.eq.s32.totalorder %s595_s13, 0 }
   0xc   : > { %s611_s18 = scalar_select %p26_p1, %s550_s11, %s28_s16  }
   0xd   : > { %p613_p5 = por %p36_p2, %p35_p0  ;;  %p617_p6 = por %p42_p4, %p41_p3 }
   0xe   : > { %p91_p7 = scmp.eq.s32.totalorder %s595_s13, 1  ;;  %p97_p8 = scmp.eq.s32.totalorder %s350_s14, 1 }
   0xf   : > { %s794_s20 = scalar_select %p617_p6, 1, 0 }
  0x10   : > { %p384_p10 = scmp.lt.s32.totalorder %s554_s12, 2  ;;  %p624_p11 = por %p91_p7, %p35_p0 }
  0x11   : > { %p628_p12 = por %p97_p8, %p41_p3  ;;  %s633_s23 = sand.u32 1, %s550_s11  }
  0x12   : > { %s795_s21 = scalar_select %p624_p11, 1, 0 }
  0x13   : > { %s796_s22 = scalar_select %p628_p12, 1, 0 }
  0x14   : > { %s354_s24 = sshll.u32 %s554_s12, 7  ;;  %s353_s25 = sshll.u32 %s633_s23, 3 }
  0x15   : > { %s642_s28 = scalar_lea.hbm %s788_s0, %s354_s24  ;;  %s121_s29 = scalar_lea.vmem [#allocation2], %s353_s25 }
  0x16   : > { %s128_s30 = sshll.u32 %s121_s29, 4  ;;  %p648_p13 = pnand %p384_p10, %p613_p5  ;;  %s652_s30 = int_to_ptr.vmem [resolvable:$true] %s128_s30 }
  0x17   : > { %s118_s4 = scalar_lea.sflag [#allocation3], %s633_s23  ;;  %s424_s5 = scalar_lea.hbm %s642_s28, 128 }
  0x18   : > { %p425_p2 = scmp.ne.s32.totalorder %s642_s28, %s424_s5  ;;  %p426_p3 = pneg %p648_p13 }
  0x19   : > { %s429_s8 = scalar_lea.hbm %s788_s0, 256  ;;  %p430_p5 = scmp.lt.u32.totalorder %s642_s28, %s788_s0 }
  0x1a   : > { %p427_p4 = pnand %p426_p3, %p425_p2  ;;  %p431_p8 = scmp.lt.u32.totalorder %s429_s8, %s424_s5 }
  0x1b   : > { %p433_p9 = scmp.lt.u32.totalorder %s424_s5, %s642_s28 }
  0x1c   : > { %p428_p7 = pneg %p427_p4  ;;  %p432_p10 = por %p431_p8, %p430_p5 }
  0x1e   : > { %p434_p0 = por %p433_p9, %p432_p10 }
  0x20   : > { %p435_p1 = pnand %p434_p0, %p428_p7 }
  0x22   : > { %438 = shalt.err (!%p435_p1)
}
  0x23   : > { %s439_s17 = scalar_lea.vmem %s652_s30, 128  ;;  %s556_s19 = smov [#allocation2]  }
  0x24   : > { %p440_p2 = scmp.ne.s32.totalorder %s652_s30, %s439_s17  ;;  %s444_s26 = sshll.u32 %s556_s19, 4  ;;  %s445_s26 = int_to_ptr.vmem [resolvable:$false] %s444_s26 }
  0x25   : > { %s446_s27 = scalar_lea.vmem %s445_s26, 256  ;;  %p447_p11 = scmp.lt.s32.totalorder %s652_s30, %s445_s26 }
  0x26   : > { %p442_p4 = pnand %p440_p2, %p426_p3  ;;  %p448_p5 = scmp.lt.s32.totalorder %s446_s27, %s439_s17 }
  0x28   : > { %p443_p12 = pneg %p442_p4  ;;  %p449_p8 = por %p448_p5, %p447_p11 }
  0x2a   : > { %p450_p9 = pnand %p449_p8, %p443_p12 }
  0x2c   : > { %453 = shalt.err (!%p450_p9)
}
  0x2d   : > { %376 = dma.hbm_to_vmem [thread:$0]  (!%p648_p13), %s642_s28, 128, %s652_s30, %s118_s4  }
  0x2e   : > { %p798_p0 = scmp.lt.s32.totalorder %s554_s12, 3  ;;  %p799_p1 = scmp.ge.s32.totalorder %s554_s12, 1 }
  0x2f   : > { %s695_s7 = scalar_lea.hbm %s789_s1, %s354_s24  ;;  %s139_s8 = scalar_lea.vmem [#allocation5], %s353_s25 }
  0x30   : > { %p686_p7 = pnand %p799_p1, %p798_p0  ;;  %s146_s14 = sshll.u32 %s139_s8, 4  ;;  %s147_s14 = int_to_ptr.vmem [resolvable:$true] %s146_s14 }
  0x31   : > { %s136_s28 = scalar_lea.sflag [#allocation6], %s633_s23  ;;  %s454_s30 = scalar_lea.hbm %s695_s7, 128 }
  0x32   : > { %s800_s29 = scalar_select %p686_p7, 1, 0 }
  0x33   : > { %p455_p11 = scmp.ne.s32.totalorder %s695_s7, %s454_s30  ;;  %s459_s24 = scalar_lea.hbm %s789_s1, 256 }
  0x34   : > { %p460_p2 = scmp.lt.u32.totalorder %s695_s7, %s789_s1  ;;  %p461_p4 = scmp.lt.u32.totalorder %s459_s24, %s454_s30 }
  0x35   : > { %p457_p12 = pnand %p455_p11, %p426_p3  ;;  %p463_p8 = scmp.lt.u32.totalorder %s454_s30, %s695_s7 }
  0x36   : > { %p462_p5 = por %p461_p4, %p460_p2 }
  0x37   : > { %p458_p10 = pneg %p457_p12 }
  0x38   : > { %p464_p9 = por %p463_p8, %p462_p5 }
  0x3a   : > { %p465_p0 = pnand %p464_p9, %p458_p10 }
  0x3c   : > { %468 = shalt.err (!%p465_p0)
}
  0x3d   : > { %s469_s23 = scalar_lea.vmem %s147_s14, 128  ;;  %s557_s25 = smov [#allocation5]  }
  0x3e   : > { %p470_p1 = scmp.ne.s32.totalorder %s147_s14, %s469_s23  ;;  %s474_s26 = sshll.u32 %s557_s25, 4  ;;  %s475_s26 = int_to_ptr.vmem [resolvable:$false] %s474_s26 }
  0x3f   : > { %s476_s27 = scalar_lea.vmem %s475_s26, 256  ;;  %p477_p6 = scmp.lt.s32.totalorder %s147_s14, %s475_s26 }
  0x40   : > { %p472_p11 = pnand %p470_p1, %p426_p3  ;;  %p478_p7 = scmp.lt.s32.totalorder %s476_s27, %s469_s23 }
  0x42   : > { %p473_p12 = pneg %p472_p11  ;;  %p479_p2 = por %p478_p7, %p477_p6 }
  0x44   : > { %p480_p4 = pnand %p479_p2, %p473_p12 }
  0x46   : > { %483 = shalt.err (!%p480_p4)
}
  0x47   : > { %379 = dma.hbm_to_vmem [thread:$0]  (!%p648_p13), %s695_s7, 128, %s147_s14, %s136_s28  }
  0x48   : > { %p801_p10 = scmp.ne.s32.totalorder %s800_s29, 0 }
  0x49   : > { %s722_s5 = sand.u32 (!%p801_p10), 1, %s546_s10   ;;  %p802_p6 = scmp.ne.s32.totalorder (!%p801_p10), %s794_s20, 0 }
  0x4a   : > { %155 = sbr.rel (%p801_p10) target bundleno = 488 (0x1e8), region = 28  ;;  %s725_s6 = sshll.u32 (!%p801_p10), %s722_s5, 3 }
  0x4b   : > { %s158_s8 = scalar_lea.sflag (!%p801_p10), [#allocation3], %s722_s5  ;;  %s161_s30 = scalar_lea.vmem (!%p801_p10), [#allocation2], %s725_s6 }
  0x51   : > { %529 = dma.done.wait (%p802_p6), %s158_s8, 128  }
  0x52   : > { %531 = vsyncadd (%p802_p6), %s158_s8, 4294967168  ;;  %s167_s3 = scalar_lea.sflag [#allocation6], %s722_s5  ;;  %s170_s29 = scalar_lea.vmem [#allocation5], %s725_s6 }
  0x53   : > { %533 = dma.done.wait (%p802_p6), %s167_s3, 128  }
  0x54   : > { %535 = vsyncadd (%p802_p6), %s167_s3, 4294967168  ;;  %v196_v0 = vld [vmem:[%s161_s30] sm:$0xff]  ;;  %vm199_vm0 = vcmask 261120   ;;  %v197_v1 = vld [vmem:[%s170_s29] sm:$0xff]  ;;  %vm230_vm5 = vcmask 7168   ;;  %s195_s20 = scalar_lea.vmem [#allocation7], %s725_s6 }
  0x55   : > { %v203_v2 = vmul.f32 %v196_v0, %v196_v0  ;;  %v207_v3 = vmul.f32 %v197_v1, %v197_v1  ;;  %v198_v4 = vmul.f32 %v197_v1, %v196_v0  ;;  %s257_s7 = sshll.u32 %s195_s20, 4  ;;  %s362_s14 = sshll.u32 %s595_s13, 7  ;;  %s741_s7 = int_to_ptr.vmem [resolvable:$true] %s257_s7 }
  0x56   : > { %s746_s24 = scalar_lea.hbm %s790_s2, %s362_s14  ;;  %s244_s17 = scalar_lea.sflag [#allocation4], %s722_s5 }
  0x57   : > { %v204_v5 = vsel %vm199_vm0, %v203_v2, 0.0  ;;  %v200_v6 = vsel %vm199_vm0, %v198_v4, 0.0  ;;  %v208_v7 = vsel %vm199_vm0, %v207_v3, 0.0  ;;  %s484_s19 = scalar_lea.vmem %s741_s7, 128  ;;  %p803_p3 = scmp.ne.s32.totalorder %s795_s21, 0 }
  0x58   : > { %205 = vadd.xlane.f32.xlu0 %v204_v5  ;;  %201 = vadd.xlane.f32.xlu1 %v200_v6  ;;  %p485_p13 = scmp.ne.s32.totalorder %s741_s7, %s484_s19  ;;  %s558_s13 = smov [#allocation7]  }
  0x59   : > { %s488_s23 = sshll.u32 %s558_s13, 4  ;;  %s489_s23 = int_to_ptr.vmem [resolvable:$false] %s488_s23 }
  0x5a   : > { %p486_p7 = pnand %p485_p13, %p803_p3  ;;  %s490_s25 = scalar_lea.vmem %s489_s23, 256 }
  0x5b   : > { %p491_p8 = scmp.lt.s32.totalorder %s741_s7, %s489_s23  ;;  %p492_p9 = scmp.lt.s32.totalorder %s490_s25, %s484_s19 }
  0x5c   : > { %209 = vadd.xlane.f32.xlu0 %v208_v7  ;;  %p487_p5 = pneg %p486_p7 }
  0x5d   : > { %p493_p0 = por %p492_p9, %p491_p8 }
  0x5f   : > { %p494_p1 = pnand %p493_p0, %p487_p5 }
  0xe5   : > { %v206_v8 = vpop.xlane.xlu0 %205  ;;  %v202_v22 = vpop.xlane.xlu1 %201 }
  0xe6   : > { %418 = vrsqrt.f32 %v206_v8  ;;  %vm213_vm1 = vcmp.eq.f32.partialorder %v206_v8, inf  ;;  %v216_v15 = vand.u32 2147483648, %v206_v8  ;;  %vm215_vm3 = vcmp.eq.f32.partialorder %v206_v8, 0.0 }
  0xe9   : > { %v210_v9 = vpop.xlane.xlu0 %209 }
  0xea   : > { %420 = vrsqrt.f32 %v210_v9  ;;  %vm220_vm2 = vcmp.eq.f32.partialorder %v210_v9, inf  ;;  %v223_v16 = vand.u32 2147483648, %v210_v9  ;;  %vm222_vm4 = vcmp.eq.f32.partialorder %v210_v9, 0.0 }
  0xf0   : > { %v419_v10 = vpop.eup %418 }
  0xf1   : > { %v212_v11 = vmul.f32 %v419_v10, %v206_v8 }
  0xf3   : > { %v214_v13 = vsel %vm213_vm1, %v206_v8, %v212_v11 }
  0xf4   : > { %v421_v12 = vpop.eup %420  ;;  %v217_v18 = vsel %vm215_vm3, %v216_v15, %v214_v13 }
  0xf5   : > { %v219_v14 = vmul.f32 %v421_v12, %v210_v9 }
  0xf7   : > { %v221_v17 = vsel %vm220_vm2, %v210_v9, %v219_v14 }
  0xf8   : > { %v224_v19 = vsel %vm222_vm4, %v223_v16, %v221_v17 }
  0xf9   : > { %v225_v20 = vmul.f32 %v224_v19, %v217_v18 }
  0xfb   : > { %v226_v21 = vmax.f32 %v225_v20, 1e-08 }
  0xfd   : > { %422 = vrcp.f32 %v226_v21 }
 0x107   : > { %v423_v23 = vpop.eup %422 }
 0x108   : > { %v228_v24 = vmul.f32 %v423_v23, %v202_v22 }
 0x10a   : > { %v229_v25 = vsub.f32 1.0, %v228_v24 }
 0x10c   : > { %v231_v26 = vsel %vm230_vm5, %v229_v25, 0.0 }
 0x10d   : > { %232 = vadd.xlane.f32.xlu1 %v231_v26 }
 0x19a   : > { %v233_v27 = vpop.xlane.xlu1 %232 }
 0x19b   : > { %v234_v28 = vrot.slane %v233_v27, 4 }
 0x19d   : > { %v235_v29 = vadd.f32 %v234_v28, %v233_v27 }
 0x19f   : > { %v236_v30 = vrot.slane %v235_v29, 2 }
 0x1a1   : > { %v237_v31 = vadd.f32 %v236_v30, %v235_v29 }
 0x1a3   : > { %v238_v32 = vrot.slane %v237_v31, 1 }
 0x1a5   : > { %v239_v33 = vadd.f32 %v238_v32, %v237_v31 }
 0x1a7   : > { %365 = vpush %v239_v33 }
 0x1d8   : > { %s366_s28 = spop %365 }
 0x1d9   : > { %v241_v34 = vstv %s366_s28 }
 0x1da   : > { %242 = vst [vmem:[%s195_s20] sm:$0xff] %v241_v34 }
 0x1db   : > { %497 = shalt.err (!%p494_p1)
}
 0x1dc   : > { %s498_s26 = scalar_lea.hbm %s746_s24, 128  ;;  %s502_s6 = scalar_lea.hbm %s790_s2, 256 }
 0x1dd   : > { %p499_p11 = scmp.ne.s32.totalorder %s746_s24, %s498_s26  ;;  %p503_p4 = scmp.lt.u32.totalorder %s746_s24, %s790_s2 }
 0x1de   : > { %p504_p10 = scmp.lt.u32.totalorder %s502_s6, %s498_s26  ;;  %p506_p13 = scmp.lt.u32.totalorder %s498_s26, %s746_s24 }
 0x1df   : > { %p500_p12 = pnand %p499_p11, %p803_p3 }
 0x1e0   : > { %p505_p6 = por %p504_p10, %p503_p4 }
 0x1e1   : > { %p501_p2 = pneg %p500_p12 }
 0x1e2   : > { %p507_p7 = por %p506_p13, %p505_p6 }
 0x1e4   : > { %p508_p5 = pnand %p507_p7, %p501_p2 }
 0x1e6   : > { %511 = shalt.err (!%p508_p5)
}
 0x1e7   : > { %371 = dma.vmem_to_hbm [thread:$0]  (%p803_p3), %s741_s7, 128, %s746_s24, %s244_s17  }
 0x1e8 PF: > { %s269_s3 = sand.u32 1, %s542_s9   ;;  %p804_p8 = scmp.ne.s32.totalorder %s796_s22, 0 }
 0x1e9   : > { %p805_p9 = scmp.ge.s32.totalorder %s554_s12, 2  ;;  %s270_s29 = scalar_lea.sflag [#allocation4], %s269_s3 }
 0x1eb   : > { %p381_p0 = pnand %p805_p9, %p804_p8 }
 0x1ed   : > { %537 = dma.done.wait (!%p381_p0), %s270_s29, 128  }
 0x1ee   : > { %539 = vsyncadd (!%p381_p0), %s270_s29, 4294967168  ;;  %p18_p1 = scmp.ge.s32.totalorder %s599_s15, 4   ;;  %s806_s9 = smov %s546_s10 }
 0x1ef   : > { %s807_s10 = smov %s550_s11  ;;  %s808_s11 = smov %s611_s18 }
 0x1f0   : > { %s809_s12 = smov %s599_s15  ;;  %20 = sbr.rel (!%p18_p1) target bundleno = 7 (0x7), region = 86 }
 0x1f7   :  { %275 = vsyncpa [#allocation3], 1 }
 0x1f8   :  { %277 = vsyncpa [#allocation3 + $0x1], 1 }
 0x1f9   :  { %278 = vsyncpa [#allocation6], 1 }
 0x1fa   :  { %280 = vsyncpa [#allocation6 + $0x1], 1 }
 0x1fb   :  { %281 = vsyncpa [#allocation4], 1 }
 0x1fc   :  { %283 = vsyncpa [#allocation4 + $0x1], 1 }

</bundles_post_ra>
